<compile_context>
chip_gen: v7x
topology: tpu7x:2x2x1
jax: 0.10.0
libtpu: 0.0.40
codegen_flags: <defaults>
</compile_context>

<pallas_src>
import numpy as np
import jax
import jax.numpy as jnp
from jax import lax
from jax.experimental import pallas as pl
from jax.experimental.pallas import tpu as pltpu


L_IN = 64  # input length: two MaxPool1d(2) -> 16 flattened features for Linear(16, 32)


def _round_up(n, m):
    return ((n + m - 1) // m) * m


# --------------------------- host-side fusion (numpy, done ONCE) --------------------------

def _conv1d_as_matrix(w, L):
    """Conv1d(k=3, padding=1) as a (Cin*L, Cout*L) matrix acting on row vectors.

    Channel-major layout: index = c*L + t.  Matches PyTorch cross-correlation:
    out[co, t] = sum_{ci,k} w[co, ci, k] * x[ci, t + k - 1] (zero padded).
    """
    Cout, Cin, K = w.shape
    M = np.zeros((Cin * L, Cout * L), np.float32)
    t_out = np.arange(L)
    for k in range(K):
        t_in = t_out + (k - 1)
        valid = (t_in >= 0) & (t_in < L)
        T = np.zeros((L, L), np.float32)
        T[t_in[valid], t_out[valid]] = 1.0
        M += np.kron(w[:, :, k].T.astype(np.float32), T)   # blocks w[co,ci,k] * T
    return M


def _pool2_selector(n, odd):
    """(n, n//2) column selector picking even (or odd) columns — MaxPool1d(2) candidates."""
    S = np.zeros((n, n // 2), np.float32)
    S[2 * np.arange(n // 2) + (1 if odd else 0), np.arange(n // 2)] = 1.0
    return S


def _build_fused_params(params):
    """Fold convs / 'same' padding / pools / conv2∘conv3 into dense per-layer matrices.

    Pure host-side numpy — call once per parameter set, never in the hot path.
    """
    (w1, b1, w2, b2, w3, b3, wl1, bl1, wl2, bl2) = [np.asarray(p, np.float32) for p in params]
    L1, L2 = L_IN, L_IN // 2

    # Stage 1: conv1 (1->16, L=64) + MaxPool1d(2).  Even/odd pooled candidates are
    # merged into a single (64, 1024) RHS = [even | odd]; the kernel takes the max
    # of the two 512-wide lane-aligned halves of the matmul result.
    W1 = _conv1d_as_matrix(w1, L1)                       # (64, 1024)
    b1r = np.repeat(b1, L1)[None, :]                     # (1, 1024)
    S1e = _pool2_selector(16 * L1, odd=False)            # (1024, 512)
    S1o = _pool2_selector(16 * L1, odd=True)
    A1 = np.concatenate([W1 @ S1e, W1 @ S1o], axis=1)    # (64, 1024)
    B1 = np.concatenate([b1r @ S1e, b1r @ S1o], axis=1)  # (1, 1024)

    # Stage 2: conv2 (16->16) ∘ conv3 (16->1) composed into one (512, 32) map in the
    # natural time layout.  MaxPool1d(2) is done in-kernel (lane shift + max); the
    # pooled values land on the even lanes of the (Bt, 32) result.
    W2 = _conv1d_as_matrix(w2, L2)                       # (512, 512)
    b2r = np.repeat(b2, L2)[None, :]                     # (1, 512)
    W3 = _conv1d_as_matrix(w3, L2)                       # (512, 32)
    b3r = np.repeat(b3, L2)[None, :]                     # (1, 32)
    M23 = W2 @ W3                                        # (512, 32)
    B23 = b2r @ W3 + b3r                                 # (1, 32)

    # Head: Linear(16,32) consumes only the even lanes of the pooled (Bt, 32) slab,
    # so interleave zero rows into its weight (no lane compaction in-kernel).
    WL1 = np.zeros((2 * wl1.shape[1], wl1.shape[0]), np.float32)   # (32, 32)
    WL1[0::2, :] = wl1.T
    BL1 = bl1[None, :]                                   # (1, 32)
    WL2 = wl2.T                                          # (32, 64)
    BL2 = bl2[None, :]                                   # (1, 64)

    # Weight matrices in bf16 (MXU-native on all generations); biases stay f32.
    wdt, bdt = jnp.bfloat16, jnp.float32
    return (jnp.asarray(A1, wdt), jnp.asarray(B1, bdt),
            jnp.asarray(M23, wdt), jnp.asarray(B23, bdt),
            jnp.asarray(WL1, wdt), jnp.asarray(BL1, bdt),
            jnp.asarray(WL2, wdt), jnp.asarray(BL2, bdt))


# ---------------------------------------- kernel ----------------------------------------

def radar_cnn3_kernel(x_ref, a1_ref, b1_ref, m23_ref, b23_ref,
                      wl1_ref, bl1_ref, wl2_ref, bl2_ref, out_ref):
    x = x_ref[...]                                                    # (Bt, 64) bf16

    # Stage 1: one matmul for both maxpool candidates, then max of the two
    # 128-lane-aligned halves.  f32 accumulate, f32 bias/max.
    y1 = jnp.dot(x, a1_ref[...], preferred_element_type=jnp.float32) + b1_ref[...]
    p1 = jnp.maximum(y1[:, :512], y1[:, 512:])                        # (Bt, 512) f32

    # Stage 2: conv2∘conv3 in one matmul, natural time layout.
    y2 = jnp.dot(p1.astype(jnp.bfloat16), m23_ref[...],
                 preferred_element_type=jnp.float32) + b23_ref[...]   # (Bt, 32) f32
    # MaxPool1d(2): circular 1-lane shift (XLU, hidden under the MXU work) + max.
    # Pooled values f[j] = max(y2[2j], y2[2j+1]) land on even lanes of `m`; odd
    # lanes are garbage but are killed by the zero rows interleaved into WL1.
    y2s = jnp.concatenate([y2[:, 1:], y2[:, :1]], axis=-1)            # y2s[:, t] = y2[:, t+1 mod 32]
    m = jnp.maximum(y2, y2s)                                          # (Bt, 32) f32

    # MLP head: Linear(16,32) (zero-interleaved) -> ReLU -> Linear(32,64) -> Softmax.
    z = jnp.dot(m.astype(jnp.bfloat16), wl1_ref[...],
                preferred_element_type=jnp.float32) + bl1_ref[...]
    z = jnp.maximum(z, 0.0)
    z = jnp.dot(z.astype(jnp.bfloat16), wl2_ref[...],
                preferred_element_type=jnp.float32) + bl2_ref[...]
    z = z - jnp.max(z, axis=-1, keepdims=True)
    e = jnp.exp(z)
    out_ref[...] = e / jnp.sum(e, axis=-1, keepdims=True)             # lane-dense (Bt, 64) store


# ------------------------------------ host wrapper ---------------------------------------

def _choose_bt(B, block_b):
    """Batch tile: multiple of 8, <= block_b, and >=2 grid steps when the batch is
    small (lets a dual-TensorCore chip split the 'parallel' batch axis)."""
    b8 = _round_up(max(B, 1), 8)
    if b8 <= 2 * block_b:
        return max(8, _round_up((b8 + 1) // 2, 8))
    return block_b


def make_radar_cnn3(params, *, block_b=1024):
    """Build fused parameters ONCE (host-side) and return a jitted forward fn.

    params = (w1, b1, w2, b2, w3, b3, wl1, bl1, wl2, bl2) with PyTorch shapes.
    Returned fn maps x:(B, 1, 64) f32 -> (B, 64) softmax probabilities (f32).
    """
    assert block_b % 8 == 0
    weights = _build_fused_params(params)   # hoisted out of the per-call hot path

    def _const_spec(a):
        nd = a.ndim
        return pl.BlockSpec(a.shape, lambda i, _nd=nd: (0,) * _nd)

    def fwd(x):
        B, Cin, L = x.shape
        assert Cin == 1 and L == L_IN, "RadarCnn3 requires (B, 1, 64) input"
        Bt = _choose_bt(B, block_b)
        Bp = _round_up(B, Bt)

        x2 = x.reshape(B, L).astype(jnp.bfloat16)
        if Bp != B:
            x2 = jnp.pad(x2, ((0, Bp - B), (0, 0)))   # padded rows are sliced off below

        grid_spec = pltpu.PrefetchScalarGridSpec(
            num_scalar_prefetch=0,
            grid=(Bp // Bt,),
            in_specs=[pl.BlockSpec((Bt, L), lambda i: (i, 0))]          # batch tile
                     + [_const_spec(w) for w in weights],               # VMEM-resident weights
            out_specs=pl.BlockSpec((Bt, 64), lambda i: (i, 0)),
        )

        out = pl.pallas_call(
            radar_cnn3_kernel,
            out_shape=jax.ShapeDtypeStruct((Bp, 64), jnp.float32),
            grid_spec=grid_spec,
            compiler_params=pltpu.CompilerParams(
                dimension_semantics=("parallel",),       # batch axis shardable on v7x
                vmem_limit_bytes=32 * 1024 * 1024,       # headroom on v5e, within v6e/v7x defaults
            ),
        )(x2, *weights)
        return out[:B]

    return jax.jit(fwd)


# ---------------------------------- pure-JAX reference -----------------------------------

def radar_cnn3_reference(x, params):
    (w1, b1, w2, b2, w3, b3, wl1, bl1, wl2, bl2) = params

    def conv1d(h, w, b):
        y = lax.conv_general_dilated(h, w, window_strides=(1,), padding=((1, 1),),
                                     dimension_numbers=("NCH", "OIH", "NCH"))
        return y + b[None, :, None]

    def maxpool2(h):
        return lax.reduce_window(h, -jnp.inf, lax.max, (1, 1, 2), (1, 1, 2), "VALID")

    h = maxpool2(conv1d(x, w1, b1))
    h = conv1d(h, w2, b2)
    h = maxpool2(conv1d(h, w3, b3))
    f = h.reshape(h.shape[0], -1)
    z = jnp.maximum(f @ wl1.T + bl1, 0.0)
    z = z @ wl2.T + bl2
    return jax.nn.softmax(z, axis=1)


# ---------------------------------------- main --------------------------------------------

if __name__ == "__main__":
    key = jax.random.PRNGKey(0)
    ks = jax.random.split(key, 12)

    def uinit(k, shape, fan_in):
        bound = 1.0 / np.sqrt(fan_in)
        return jax.random.uniform(k, shape, jnp.float32, -bound, bound)

    # Deterministic parameters (shapes from RadarCnn3.__init__).
    w1 = uinit(ks[0], (16, 1, 3), 3)     # Conv1d(1, 16, 3, padding=1)
    b1 = uinit(ks[1], (16,), 3)
    w2 = uinit(ks[2], (16, 16, 3), 48)   # Conv1d(16, 16, 3, padding=1)
    b2 = uinit(ks[3], (16,), 48)
    w3 = uinit(ks[4], (1, 16, 3), 48)    # Conv1d(16, 1, 3, padding=1)
    b3 = uinit(ks[5], (1,), 48)
    wl1 = uinit(ks[6], (32, 16), 16)     # Linear(16, 32)
    bl1 = uinit(ks[7], (32,), 16)
    wl2 = uinit(ks[8], (64, 32), 32)     # Linear(32, 64)
    bl2 = uinit(ks[9], (64,), 32)
    params = (w1, b1, w2, b2, w3, b3, wl1, bl1, wl2, bl2)

    # Input length 64 so that after two MaxPool1d(2) the flatten yields 16 features.
    x = jax.random.normal(ks[10], (20, 1, 64), jnp.float32)

    fwd = make_radar_cnn3(params)                      # fused params built once
    out = jax.block_until_ready(fwd(x))
    ref = jax.block_until_ready(radar_cnn3_reference(x, params))
    np.testing.assert_allclose(np.asarray(out), np.asarray(ref), rtol=1e-2, atol=3e-3)
    assert out.shape == (20, 64)
    np.testing.assert_allclose(np.asarray(out).sum(axis=1), np.ones(20), rtol=0, atol=1e-3)

    # Exercise the multi-tile grid path (padding + several batch blocks).
    x2 = jax.random.normal(ks[11], (37, 1, 64), jnp.float32)
    fwd_small = make_radar_cnn3(params, block_b=16)    # forces Bt=16 -> 3 grid steps
    out2 = jax.block_until_ready(fwd_small(x2))
    ref2 = radar_cnn3_reference(x2, params)
    np.testing.assert_allclose(np.asarray(out2), np.asarray(ref2), rtol=1e-2, atol=3e-3)

    print("KERNEL_OK")
</pallas_src>

<mosaic_0001>
module attributes {stable_mosaic.version = 11 : i64} {
  func.func @radar_cnn3_kernel(%arg0: i32, %arg1: memref<16x64xbf16, #tpu.memory_space<vmem>>, %arg2: memref<64x1024xbf16, #tpu.memory_space<vmem>>, %arg3: memref<1x1024xf32, #tpu.memory_space<vmem>>, %arg4: memref<512x32xbf16, #tpu.memory_space<vmem>>, %arg5: memref<1x32xf32, #tpu.memory_space<vmem>>, %arg6: memref<32x32xbf16, #tpu.memory_space<vmem>>, %arg7: memref<1x32xf32, #tpu.memory_space<vmem>>, %arg8: memref<32x64xbf16, #tpu.memory_space<vmem>>, %arg9: memref<1x64xf32, #tpu.memory_space<vmem>>, %arg10: memref<16x64xf32, #tpu.memory_space<vmem>>) attributes {dimension_semantics = [#tpu.dimension_semantics<parallel>], iteration_bounds = array<i64: 2>, scalar_prefetch = 0 : i64, scratch_operands = 0 : i64, tpu.core_type = #tpu.core_type<tc>, window_params = [{transform_indices = @transform_0, window_bounds = array<i64: 16, 64>}, {pipeline_mode = #tpu.pipeline_mode<synchronous>, transform_indices = @transform_1, window_bounds = array<i64: 64, 1024>}, {pipeline_mode = #tpu.pipeline_mode<synchronous>, transform_indices = @transform_2, window_bounds = array<i64: 1, 1024>}, {pipeline_mode = #tpu.pipeline_mode<synchronous>, transform_indices = @transform_3, window_bounds = array<i64: 512, 32>}, {pipeline_mode = #tpu.pipeline_mode<synchronous>, transform_indices = @transform_4, window_bounds = array<i64: 1, 32>}, {pipeline_mode = #tpu.pipeline_mode<synchronous>, transform_indices = @transform_5, window_bounds = array<i64: 32, 32>}, {pipeline_mode = #tpu.pipeline_mode<synchronous>, transform_indices = @transform_6, window_bounds = array<i64: 1, 32>}, {pipeline_mode = #tpu.pipeline_mode<synchronous>, transform_indices = @transform_7, window_bounds = array<i64: 32, 64>}, {pipeline_mode = #tpu.pipeline_mode<synchronous>, transform_indices = @transform_8, window_bounds = array<i64: 1, 64>}, {transform_indices = @transform_9, window_bounds = array<i64: 16, 64>}]} {
    %c0 = arith.constant 0 : index
    %c0_0 = arith.constant 0 : index
    %0 = vector.load %arg1[%c0, %c0_0] : memref<16x64xbf16, #tpu.memory_space<vmem>>, vector<16x64xbf16>
    %c0_1 = arith.constant 0 : index
    %c0_2 = arith.constant 0 : index
    %1 = vector.load %arg2[%c0_1, %c0_2] : memref<64x1024xbf16, #tpu.memory_space<vmem>>, vector<64x1024xbf16>
    %cst = arith.constant dense<0.000000e+00> : vector<16x1024xf32>
    %2 = tpu.matmul %0, %1, %cst {dimension_numbers = #tpu.dot_dimension_numbers<[1], [0], [0], [1], [0, 0, 1, 1], [], []>} : vector<16x64xbf16>, vector<64x1024xbf16>, vector<16x1024xf32> -> vector<16x1024xf32>
    %c0_3 = arith.constant 0 : index
    %c0_4 = arith.constant 0 : index
    %3 = vector.load %arg3[%c0_3, %c0_4] : memref<1x1024xf32, #tpu.memory_space<vmem>>, vector<1x1024xf32>
    %4 = vector.broadcast %3 : vector<1x1024xf32> to vector<16x1024xf32>
    %5 = arith.addf %2, %4 : vector<16x1024xf32>
    %6 = vector.extract_strided_slice %5 {offsets = [0, 0], sizes = [16, 512], strides = [1, 1]} : vector<16x1024xf32> to vector<16x512xf32>
    %7 = vector.extract_strided_slice %5 {offsets = [0, 512], sizes = [16, 512], strides = [1, 1]} : vector<16x1024xf32> to vector<16x512xf32>
    %8 = arith.maximumf %6, %7 : vector<16x512xf32>
    %9 = arith.truncf %8 : vector<16x512xf32> to vector<16x512xbf16>
    %c0_5 = arith.constant 0 : index
    %c0_6 = arith.constant 0 : index
    %10 = vector.load %arg4[%c0_5, %c0_6] : memref<512x32xbf16, #tpu.memory_space<vmem>>, vector<512x32xbf16>
    %cst_7 = arith.constant dense<0.000000e+00> : vector<16x32xf32>
    %11 = tpu.matmul %9, %10, %cst_7 {dimension_numbers = #tpu.dot_dimension_numbers<[1], [0], [0], [1], [0, 0, 1, 1], [], []>} : vector<16x512xbf16>, vector<512x32xbf16>, vector<16x32xf32> -> vector<16x32xf32>
    %c0_8 = arith.constant 0 : index
    %c0_9 = arith.constant 0 : index
    %12 = vector.load %arg5[%c0_8, %c0_9] : memref<1x32xf32, #tpu.memory_space<vmem>>, vector<1x32xf32>
    %13 = vector.broadcast %12 : vector<1x32xf32> to vector<16x32xf32>
    %14 = arith.addf %11, %13 : vector<16x32xf32>
    %15 = vector.extract_strided_slice %14 {offsets = [0, 1], sizes = [16, 31], strides = [1, 1]} : vector<16x32xf32> to vector<16x31xf32>
    %16 = vector.extract_strided_slice %14 {offsets = [0, 0], sizes = [16, 1], strides = [1, 1]} : vector<16x32xf32> to vector<16x1xf32>
    %17 = tpu.concatenate %15, %16 in 1 : vector<16x31xf32>, vector<16x1xf32> -> vector<16x32xf32>
    %18 = arith.maximumf %14, %17 : vector<16x32xf32>
    %19 = arith.truncf %18 : vector<16x32xf32> to vector<16x32xbf16>
    %c0_10 = arith.constant 0 : index
    %c0_11 = arith.constant 0 : index
    %20 = vector.load %arg6[%c0_10, %c0_11] : memref<32x32xbf16, #tpu.memory_space<vmem>>, vector<32x32xbf16>
    %cst_12 = arith.constant dense<0.000000e+00> : vector<16x32xf32>
    %21 = tpu.matmul %19, %20, %cst_12 {dimension_numbers = #tpu.dot_dimension_numbers<[1], [0], [0], [1], [0, 0, 1, 1], [], []>} : vector<16x32xbf16>, vector<32x32xbf16>, vector<16x32xf32> -> vector<16x32xf32>
    %c0_13 = arith.constant 0 : index
    %c0_14 = arith.constant 0 : index
    %22 = vector.load %arg7[%c0_13, %c0_14] : memref<1x32xf32, #tpu.memory_space<vmem>>, vector<1x32xf32>
    %23 = vector.broadcast %22 : vector<1x32xf32> to vector<16x32xf32>
    %24 = arith.addf %21, %23 : vector<16x32xf32>
    %cst_15 = arith.constant 0.000000e+00 : f32
    %25 = vector.broadcast %cst_15 : f32 to vector<16x32xf32>
    %26 = arith.maximumf %24, %25 : vector<16x32xf32>
    %27 = arith.truncf %26 : vector<16x32xf32> to vector<16x32xbf16>
    %c0_16 = arith.constant 0 : index
    %c0_17 = arith.constant 0 : index
    %28 = vector.load %arg8[%c0_16, %c0_17] : memref<32x64xbf16, #tpu.memory_space<vmem>>, vector<32x64xbf16>
    %cst_18 = arith.constant dense<0.000000e+00> : vector<16x64xf32>
    %29 = tpu.matmul %27, %28, %cst_18 {dimension_numbers = #tpu.dot_dimension_numbers<[1], [0], [0], [1], [0, 0, 1, 1], [], []>} : vector<16x32xbf16>, vector<32x64xbf16>, vector<16x64xf32> -> vector<16x64xf32>
    %c0_19 = arith.constant 0 : index
    %c0_20 = arith.constant 0 : index
    %30 = vector.load %arg9[%c0_19, %c0_20] : memref<1x64xf32, #tpu.memory_space<vmem>>, vector<1x64xf32>
    %31 = vector.broadcast %30 : vector<1x64xf32> to vector<16x64xf32>
    %32 = arith.addf %29, %31 : vector<16x64xf32>
    %cst_21 = arith.constant dense<0xFF800000> : vector<16xf32>
    %33 = vector.multi_reduction <maximumf>, %32, %cst_21 [1] : vector<16x64xf32> to vector<16xf32>
    %34 = vector.shape_cast %33 : vector<16xf32> to vector<16x1xf32>
    %35 = vector.broadcast %34 : vector<16x1xf32> to vector<16x64xf32>
    %36 = arith.subf %32, %35 : vector<16x64xf32>
    %37 = math.exp %36 : vector<16x64xf32>
    %cst_22 = arith.constant dense<0.000000e+00> : vector<16xf32>
    %38 = vector.multi_reduction <add>, %37, %cst_22 [1] : vector<16x64xf32> to vector<16xf32>
    %39 = vector.shape_cast %38 : vector<16xf32> to vector<16x1xf32>
    %40 = vector.broadcast %39 : vector<16x1xf32> to vector<16x64xf32>
    %41 = arith.divf %37, %40 : vector<16x64xf32>
    %c0_23 = arith.constant 0 : index
    %c0_24 = arith.constant 0 : index
    %42 = vector.load %arg10[%c0_23, %c0_24] : memref<16x64xf32, #tpu.memory_space<vmem>>, vector<16x64xf32>
    tpu.vector_store %arg10[%c0_23, %c0_24], %41 {strides = array<i32>} : memref<16x64xf32, #tpu.memory_space<vmem>>, vector<16x64xf32>,
    return
  }
  func.func @transform_0(%arg0: i32) -> (i32, i32) {
    %c0_i32 = arith.constant 0 : i32
    %c0_i32_0 = arith.constant 0 : i32
    return %arg0, %c0_i32 : i32, i32
  }
  func.func @transform_1(%arg0: i32) -> (i32, i32) {
    %c0_i32 = arith.constant 0 : i32
    %c0_i32_0 = arith.constant 0 : i32
    %c0_i32_1 = arith.constant 0 : i32
    return %c0_i32, %c0_i32_0 : i32, i32
  }
  func.func @transform_2(%arg0: i32) -> (i32, i32) {
    %c0_i32 = arith.constant 0 : i32
    %c0_i32_0 = arith.constant 0 : i32
    %c0_i32_1 = arith.constant 0 : i32
    return %c0_i32, %c0_i32_0 : i32, i32
  }
  func.func @transform_3(%arg0: i32) -> (i32, i32) {
    %c0_i32 = arith.constant 0 : i32
    %c0_i32_0 = arith.constant 0 : i32
    %c0_i32_1 = arith.constant 0 : i32
    return %c0_i32, %c0_i32_0 : i32, i32
  }
  func.func @transform_4(%arg0: i32) -> (i32, i32) {
    %c0_i32 = arith.constant 0 : i32
    %c0_i32_0 = arith.constant 0 : i32
    %c0_i32_1 = arith.constant 0 : i32
    return %c0_i32, %c0_i32_0 : i32, i32
  }
  func.func @transform_5(%arg0: i32) -> (i32, i32) {
    %c0_i32 = arith.constant 0 : i32
    %c0_i32_0 = arith.constant 0 : i32
    %c0_i32_1 = arith.constant 0 : i32
    return %c0_i32, %c0_i32_0 : i32, i32
  }
  func.func @transform_6(%arg0: i32) -> (i32, i32) {
    %c0_i32 = arith.constant 0 : i32
    %c0_i32_0 = arith.constant 0 : i32
    %c0_i32_1 = arith.constant 0 : i32
    return %c0_i32, %c0_i32_0 : i32, i32
  }
  func.func @transform_7(%arg0: i32) -> (i32, i32) {
    %c0_i32 = arith.constant 0 : i32
    %c0_i32_0 = arith.constant 0 : i32
    %c0_i32_1 = arith.constant 0 : i32
    return %c0_i32, %c0_i32_0 : i32, i32
  }
  func.func @transform_8(%arg0: i32) -> (i32, i32) {
    %c0_i32 = arith.constant 0 : i32
    %c0_i32_0 = arith.constant 0 : i32
    %c0_i32_1 = arith.constant 0 : i32
    return %c0_i32, %c0_i32_0 : i32, i32
  }
  func.func @transform_9(%arg0: i32) -> (i32, i32) {
    %c0_i32 = arith.constant 0 : i32
    %c0_i32_0 = arith.constant 0 : i32
    return %arg0, %c0_i32 : i32, i32
  }
}

</mosaic_0001>

<bundles_post_ra>
// kernel: fwd.1
= control target key start
LH: loop header
LB: loop body
LE: loop exit
PB: predicated region body
PF: predicated region fallthrough
CT: control target
= control target key end

     0   :  { %s1635_s30 = smov 0   ;;  %s1888_s0 = inlined_call_operand.vmem [shape: bf16[32,64], index: 0, kind: input, shape index: {}]   ;;  %s1889_s1 = inlined_call_operand.vmem [shape: bf16[64,1024], index: 1, kind: input, shape index: {}]   ;;  %s1890_s2 = inlined_call_operand.vmem [shape: f32[1,1024], index: 2, kind: input, shape index: {}]   ;;  %s1891_s3 = inlined_call_operand.vmem [shape: bf16[512,32], index: 3, kind: input, shape index: {}]   ;;  %s1892_s4 = inlined_call_operand.vmem [shape: f32[1,32], index: 4, kind: input, shape index: {}]   ;;  %s1893_s5 = inlined_call_operand.vmem [shape: bf16[32,32], index: 5, kind: input, shape index: {}]   ;;  %s1894_s6 = inlined_call_operand.vmem [shape: f32[1,32], index: 6, kind: input, shape index: {}]   ;;  %s1895_s7 = inlined_call_operand.vmem [shape: bf16[32,64], index: 7, kind: input, shape index: {}]   ;;  %s1896_s8 = inlined_call_operand.vmem [shape: f32[1,64], index: 8, kind: input, shape index: {}]   ;;  %s1897_s9 = inlined_call_operand.vmem [shape: f32[32,64], index: 9, kind: output, shape index: {}]  }
   0x1 LB: > { %s1349_s10 = sadd.s32 4294967295, %s1578_s30   ;;  %p1353_p0 = scmp.ge.s32.totalorder %s1578_s30, 1  ;;  %s1578_s30 = sphi %s1635_s30, %s19_s30  }
   0x2   : > { %p288_p1 = scmp.lt.s32.totalorder %s1578_s30, 3 }
   0x4   : > { %p289_p2 = pnand %p1353_p0, %p288_p1 }
   0x5   : > { %v339_v0 = vld [vmem:[%s1889_s1] sm:$0xff] (!%p289_p2)  ;;  %v340_v2 = vld [vmem:[%s1889_s1 + $0x8] sm:$0xff] (!%p289_p2)  ;;  %s1354_s17 = sshll.u32 (!%p289_p2), %s1349_s10, 1  ;;  %v1580_v8 = vmov (!%p289_p2), 0   ;;  %v341_v31 = vld [vmem:[%s1889_s1 + $0x10] sm:$0xff] (!%p289_p2)  ;;  %vm578_vm0 = vcmask (!%p289_p2), 523264  }
   0x6   : > { %292 = sbr.rel (%p289_p2) target bundleno = 1365 (0x555), region = 56  ;;  %v343_v1 = vld [vmem:[%s1889_s1 + $0x20] sm:$0xff] (!%p289_p2)  ;;  %v344_v4 = vld [vmem:[%s1889_s1 + $0x28] sm:$0xff] (!%p289_p2)  ;;  %614 = vmatprep.mubr.bf16.mxu0 (!%p289_p2), %v1580_v8  ;;  %657 = vmatprep.mubr.bf16.mxu1 (!%p289_p2), %v1580_v8  ;;  %p325_p3 = scmp.lt.s32.totalorder (!%p289_p2), %s1354_s17, 3  ;;  %v345_v32 = vld [vmem:[%s1889_s1 + $0x30] sm:$0xff] (!%p289_p2)  ;;  %vm1582_vm1 = vmmov (!%p289_p2), 0  }
   0x7   : > { %v1360_v3 = vcombine.high (!%p289_p2), %v339_v0, %v343_v1  ;;  %v1359_v5 = vcombine.low (!%p289_p2), %v339_v0, %v343_v1  ;;  %v347_v6 = vld [vmem:[%s1889_s1 + $0x40] sm:$0xff] (!%p289_p2)  ;;  %v1362_v9 = vcombine.high (!%p289_p2), %v340_v2, %v344_v4  ;;  %v1361_v10 = vcombine.low (!%p289_p2), %v340_v2, %v344_v4  ;;  %v348_v12 = vld [vmem:[%s1889_s1 + $0x48] sm:$0xff] (!%p289_p2)  ;;  %v342_v33 = vld [vmem:[%s1889_s1 + $0x18] sm:$0xff] (!%p289_p2)  ;;  %s1583_s19 = smov (!%p289_p2), 127   ;;  %s1584_s20 = smov (!%p289_p2), 31  }
   0x8   : > { %v351_v7 = vld [vmem:[%s1889_s1 + $0x60] sm:$0xff] (!%p289_p2)  ;;  %v352_v13 = vld [vmem:[%s1889_s1 + $0x68] sm:$0xff] (!%p289_p2)  ;;  %v346_v34 = vld [vmem:[%s1889_s1 + $0x38] sm:$0xff] (!%p289_p2)  ;;  %v1364_v39 = vcombine.high (!%p289_p2), %v341_v31, %v345_v32  ;;  %v1363_v44 = vcombine.low (!%p289_p2), %v341_v31, %v345_v32  ;;  %vm1125_vm2 = vcmask (!%p289_p2), 252928   ;;  %vm1154_vm3 = vcmask (!%p289_p2), 261120  }
   0x9   : > { %v1368_v11 = vcombine.high (!%p289_p2), %v347_v6, %v351_v7  ;;  %v355_v14 = vld [vmem:[%s1889_s1 + $0x80] sm:$0xff] (!%p289_p2)  ;;  %582 = vmatprep.subr.bf16.mxu0 (!%p289_p2), %v1360_v3  ;;  %v1370_v15 = vcombine.high (!%p289_p2), %v348_v12, %v352_v13  ;;  %v356_v17 = vld [vmem:[%s1889_s1 + $0x88] sm:$0xff] (!%p289_p2)  ;;  %625 = vmatprep.subr.bf16.mxu1 (!%p289_p2), %v1362_v9  ;;  %v1367_v19 = vcombine.low (!%p289_p2), %v347_v6, %v351_v7  ;;  %v349_v36 = vld [vmem:[%s1889_s1 + $0x50] sm:$0xff] (!%p289_p2) }
   0xa   : > { %v359_v16 = vld [vmem:[%s1889_s1 + $0xa0] sm:$0xff] (!%p289_p2)  ;;  %v360_v18 = vld [vmem:[%s1889_s1 + $0xa8] sm:$0xff] (!%p289_p2)  ;;  %583 = vmatpush1.bf16.msra.mxu0 (!%p289_p2), %v1359_v5  ;;  %626 = vmatpush1.bf16.msra.mxu1 (!%p289_p2), %v1361_v10  ;;  %v1369_v20 = vcombine.low (!%p289_p2), %v348_v12, %v352_v13  ;;  %v353_v40 = vld [vmem:[%s1889_s1 + $0x70] sm:$0xff] (!%p289_p2)  ;;  %v1366_v41 = vcombine.high (!%p289_p2), %v342_v33, %v346_v34  ;;  %v1365_v47 = vcombine.low (!%p289_p2), %v342_v33, %v346_v34  ;;  %v373_v34 = vlaneseq (!%p289_p2) }
   0xb   : > { %584 = vmatprep.subr.bf16.mxu0 (!%p289_p2), %v1368_v11  ;;  %v1376_v21 = vcombine.high (!%p289_p2), %v355_v14, %v359_v16  ;;  %627 = vmatprep.subr.bf16.mxu1 (!%p289_p2), %v1370_v15  ;;  %v1378_v22 = vcombine.high (!%p289_p2), %v356_v17, %v360_v18  ;;  %v363_v23 = vld [vmem:[%s1889_s1 + $0xc0] sm:$0xff] (!%p289_p2)  ;;  %v364_v25 = vld [vmem:[%s1889_s1 + $0xc8] sm:$0xff] (!%p289_p2)  ;;  %v1375_v27 = vcombine.low (!%p289_p2), %v355_v14, %v359_v16  ;;  %v350_v42 = vld [vmem:[%s1889_s1 + $0x58] sm:$0xff] (!%p289_p2) }
   0xc   : > { %v367_v24 = vld [vmem:[%s1889_s1 + $0xe0] sm:$0xff] (!%p289_p2)  ;;  %v368_v26 = vld [vmem:[%s1889_s1 + $0xe8] sm:$0xff] (!%p289_p2)  ;;  %v1377_v28 = vcombine.low (!%p289_p2), %v356_v17, %v360_v18  ;;  %v354_v43 = vld [vmem:[%s1889_s1 + $0x78] sm:$0xff] (!%p289_p2)  ;;  %v1372_v48 = vcombine.high (!%p289_p2), %v349_v36, %v353_v40  ;;  %v1371_v52 = vcombine.low (!%p289_p2), %v349_v36, %v353_v40 }
   0xd   : > { %s1899_s17 = smov (!%p325_p3, %s1354_s17), 3  ;;  %v1384_v29 = vcombine.high %v363_v23, %v367_v24  ;;  %v1386_v30 = vcombine.high %v364_v25, %v368_v26  ;;  %v1383_v35 = vcombine.low %v363_v23, %v367_v24  ;;  %v1385_v37 = vcombine.low %v364_v25, %v368_v26  ;;  %v357_v45 = vld [vmem:[%s1889_s1 + $0x90] sm:$0xff]  ;;  %v358_v49 = vld [vmem:[%s1889_s1 + $0x98] sm:$0xff]  ;;  %v1528_v0 = vld [vmem:[%s1891_s3 + $0x40] sm:$0xff]  }
   0xe   : > { %s1355_s16 = sshll.u32 %s1899_s17, 2  ;;  %585 = vmatpush1.bf16.msra.mxu0 %v1367_v19  ;;  %628 = vmatpush1.bf16.msra.mxu1 %v1369_v20  ;;  %v361_v46 = vld [vmem:[%s1889_s1 + $0xb0] sm:$0xff]  ;;  %v362_v50 = vld [vmem:[%s1889_s1 + $0xb8] sm:$0xff]  ;;  %v1374_v51 = vcombine.high %v350_v42, %v354_v43  ;;  %v1373_v55 = vcombine.low %v350_v42, %v354_v43  ;;  %v1529_v2 = vld [vmem:[%s1891_s3 + $0xc0] sm:$0xff]   ;;  %v374_v42 = vshrl.u32 %v373_v34, 7  ;;  %s1357_s29 = sshll.u32 %s1899_s17, 3 }
   0xf   : > { %s328_s26 = scalar_lea.vmem %s1888_s0, %s1355_s16  ;;  %586 = vmatprep.subr.bf16.mxu0 %v1376_v21  ;;  %629 = vmatprep.subr.bf16.mxu1 %v1378_v22  ;;  %v365_v53 = vld [vmem:[%s1889_s1 + $0xd0] sm:$0xff]  ;;  %v1380_v56 = vcombine.high %v357_v45, %v361_v46  ;;  %v366_v57 = vld [vmem:[%s1889_s1 + $0xd8] sm:$0xff]  ;;  %v1382_v59 = vcombine.high %v358_v49, %v362_v50  ;;  %v1379_v60 = vcombine.low %v357_v45, %v361_v46  ;;  %v1530_v4 = vld [vmem:[%s1891_s3] sm:$0xff]   ;;  %s334_s12 = scalar_lea.vmem %s1897_s9, %s1357_s29 }
  0x10   : > { %v1527_v38 = vld [vmem:[%s328_s26] sm:$0xff]   ;;  %v369_v54 = vld [vmem:[%s1889_s1 + $0xf0] sm:$0xff]  ;;  %v370_v58 = vld [vmem:[%s1889_s1 + $0xf8] sm:$0xff]  ;;  %v1381_v61 = vcombine.low %v358_v49, %v362_v50  ;;  %v383_v46 = vsub.s32 2, %v374_v42  ;;  %v391_v49 = vsub.s32 4, %v374_v42  ;;  %v399_v50 = vsub.s32 6, %v374_v42 }
  0x11   : > { %v1388_v62 = vcombine.high %v365_v53, %v369_v54  ;;  %v1390_v63 = vcombine.high %v366_v57, %v370_v58  ;;  %v1387_v1 = vcombine.low %v365_v53, %v369_v54  ;;  %v1389_v3 = vcombine.low %v366_v57, %v370_v58  ;;  %v1531_v5 = vld [vmem:[%s1891_s3 + $0x80] sm:$0xff]   ;;  %v1532_v6 = vld [vmem:[%s1891_s3 + $0x48] sm:$0xff]   ;;  %v1536_v10 = vld [vmem:[%s1891_s3 + $0x50] sm:$0xff]  }
  0x12   : > { %587 = vmatpush1.bf16.msra.mxu0 %v1375_v27  ;;  %630 = vmatpush1.bf16.msra.mxu1 %v1377_v28  ;;  %v1533_v7 = vld [vmem:[%s1891_s3 + $0xc8] sm:$0xff]   ;;  %v1537_v11 = vld [vmem:[%s1891_s3 + $0xd0] sm:$0xff]   ;;  %v1540_v14 = vld [vmem:[%s1891_s3 + $0x58] sm:$0xff]  }
  0x13   : > { %588 = vmatprep.subr.bf16.mxu0 %v1384_v29  ;;  %631 = vmatprep.subr.bf16.mxu1 %v1386_v30  ;;  %v1535_v9 = vld [vmem:[%s1891_s3 + $0x88] sm:$0xff]   ;;  %v1538_v12 = vld [vmem:[%s1891_s3 + $0x10] sm:$0xff]   ;;  %v1541_v15 = vld [vmem:[%s1891_s3 + $0xd8] sm:$0xff]  }
  0x14   : > { %v1539_v13 = vld [vmem:[%s1891_s3 + $0x90] sm:$0xff]   ;;  %v1542_v16 = vld [vmem:[%s1891_s3 + $0x18] sm:$0xff]   ;;  %v1544_v18 = vld [vmem:[%s1891_s3 + $0x60] sm:$0xff]  }
  0x15   : > { %v1543_v17 = vld [vmem:[%s1891_s3 + $0x98] sm:$0xff]   ;;  %v1545_v19 = vld [vmem:[%s1891_s3 + $0xe0] sm:$0xff]   ;;  %v1548_v22 = vld [vmem:[%s1891_s3 + $0x68] sm:$0xff]  }
  0x16   : > { %589 = vmatpush1.bf16.msra.mxu0 %v1383_v35  ;;  %632 = vmatpush1.bf16.msra.mxu1 %v1385_v37  ;;  %v1546_v20 = vld [vmem:[%s1891_s3 + $0x20] sm:$0xff]   ;;  %v1549_v23 = vld [vmem:[%s1891_s3 + $0xe8] sm:$0xff]   ;;  %v1552_v26 = vld [vmem:[%s1891_s3 + $0x70] sm:$0xff]  }
  0x17   : > { %668 = vmatprep.subr.bf16.mxu0 %v1364_v39  ;;  %711 = vmatprep.subr.bf16.mxu1 %v1366_v41  ;;  %v1547_v21 = vld [vmem:[%s1891_s3 + $0xa0] sm:$0xff]   ;;  %v1550_v24 = vld [vmem:[%s1891_s3 + $0x28] sm:$0xff]   ;;  %v1553_v27 = vld [vmem:[%s1891_s3 + $0xf0] sm:$0xff]  }
  0x18   : > { %v1551_v25 = vld [vmem:[%s1891_s3 + $0xa8] sm:$0xff]   ;;  %v1554_v28 = vld [vmem:[%s1891_s3 + $0x30] sm:$0xff]   ;;  %v1556_v30 = vld [vmem:[%s1891_s3 + $0x78] sm:$0xff]  }
  0x19   : > { %1391 = vmatmul.mubr.msk.bf16.vlgmr.msra.gmra.mrb[0].mxu0 %vm578_vm0, %v1527_v38  ;;  %1392 = vmatmul.mubr.msk.bf16.vlgmr.msra.gmra.mrb[0].mxu1 %vm578_vm0, %v1527_v38  ;;  %v1555_v29 = vld [vmem:[%s1891_s3 + $0xb0] sm:$0xff]   ;;  %v1557_v31 = vld [vmem:[%s1891_s3 + $0xf8] sm:$0xff]   ;;  %v371_v45 = vld [vmem:[%s1890_s2] sm:$0xff] }
  0x1a   : > { %669 = vmatpush1.bf16.msra.mxu0 %v1363_v44  ;;  %712 = vmatpush1.bf16.msra.mxu1 %v1365_v47  ;;  %v1558_v32 = vld [vmem:[%s1891_s3 + $0x38] sm:$0xff]   ;;  %v375_v44 = vsub.s32 0, %v374_v42  ;;  %v379_v47 = vsub.s32 1, %v374_v42  ;;  %v384_v54 = vrot.slane %v371_v45, %v383_v46  ;;  %v392_v57 = vrot.slane %v371_v45, %v391_v49 }
  0x1b   : > { %670 = vmatprep.subr.bf16.mxu0 %v1372_v48  ;;  %713 = vmatprep.subr.bf16.mxu1 %v1374_v51  ;;  %v1559_v33 = vld [vmem:[%s1891_s3 + $0xb8] sm:$0xff]   ;;  %v387_v48 = vsub.s32 3, %v374_v42  ;;  %v395_v51 = vsub.s32 5, %v374_v42  ;;  %v400_v58 = vrot.slane %v371_v45, %v399_v50 }
  0x1c   : > { %700 = vmatprep.mubr.bf16.mxu0 %v1580_v8  ;;  %743 = vmatprep.mubr.bf16.mxu1 %v1580_v8  ;;  %v1534_v8 = vld [vmem:[%s1891_s3 + $0x8] sm:$0xff]   ;;  %v376_v53 = vrot.slane %v371_v45, %v375_v44 }
  0x1e   : > { %671 = vmatpush1.bf16.msra.mxu0 %v1371_v52  ;;  %714 = vmatpush1.bf16.msra.mxu1 %v1373_v55  ;;  %v403_v52 = vsub.s32 7, %v374_v42  ;;  %v380_v55 = vrot.slane %v371_v45, %v379_v47 }
  0x1f   : > { %672 = vmatprep.subr.bf16.mxu0 %v1380_v56  ;;  %715 = vmatprep.subr.bf16.mxu1 %v1382_v59  ;;  %v388_v56 = vrot.slane %v371_v45, %v387_v48  ;;  %v396_v59 = vrot.slane %v371_v45, %v395_v51  ;;  %v1561_v51 = vld [vmem:[%s1893_s5 + $0x8] sm:$0xff]  }
  0x22   : > { %673 = vmatpush1.bf16.msra.mxu0 %v1379_v60  ;;  %716 = vmatpush1.bf16.msra.mxu1 %v1381_v61  ;;  %v404_v60 = vrot.slane %v371_v45, %v403_v52 }
  0x23   : > { %674 = vmatprep.subr.bf16.mxu0 %v1388_v62  ;;  %717 = vmatprep.subr.bf16.mxu1 %v1390_v63 }
  0x26   : > { %675 = vmatpush1.bf16.msra.mxu0 %v1387_v1  ;;  %718 = vmatpush1.bf16.msra.mxu1 %v1389_v3 }
  0x27   : > { %1438 = vmatprep.subr.bf16.mxu0 %v1528_v0  ;;  %1460 = vmatprep.subr.bf16.mxu1 %v1529_v2 }
  0x29   : > { %1393 = vmatmul.mubr.msk.bf16.vlgmr.msra.gmra.mrb[4].mxu0 %vm578_vm0, %v1527_v38  ;;  %1394 = vmatmul.mubr.msk.bf16.vlgmr.msra.gmra.mrb[4].mxu1 %vm578_vm0, %v1527_v38 }
  0x2a   : > { %1439 = vmatpush3.bf16.msra.mxu0 %v1530_v4  ;;  %1461 = vmatpush3.bf16.msra.mxu1 %v1531_v5 }
  0x2b   : > { %1440 = vmatprep.subr.bf16.mxu0 %v1532_v6  ;;  %1462 = vmatprep.subr.bf16.mxu1 %v1533_v7 }
  0x2e   : > { %1441 = vmatpush3.bf16.msra.mxu0 %v1534_v8  ;;  %1463 = vmatpush3.bf16.msra.mxu1 %v1535_v9 }
  0x2f   : > { %1442 = vmatprep.subr.bf16.mxu0 %v1536_v10  ;;  %1464 = vmatprep.subr.bf16.mxu1 %v1537_v11 }
  0x32   : > { %1443 = vmatpush3.bf16.msra.mxu0 %v1538_v12  ;;  %1465 = vmatpush3.bf16.msra.mxu1 %v1539_v13 }
  0x33   : > { %1444 = vmatprep.subr.bf16.mxu0 %v1540_v14  ;;  %1466 = vmatprep.subr.bf16.mxu1 %v1541_v15 }
  0x36   : > { %1445 = vmatpush3.bf16.msra.mxu0 %v1542_v16  ;;  %1467 = vmatpush3.bf16.msra.mxu1 %v1543_v17 }
  0x37   : > { %1446 = vmatprep.subr.bf16.mxu0 %v1544_v18  ;;  %1468 = vmatprep.subr.bf16.mxu1 %v1545_v19 }
  0x3a   : > { %1447 = vmatpush3.bf16.msra.mxu0 %v1546_v20  ;;  %1469 = vmatpush3.bf16.msra.mxu1 %v1547_v21 }
  0x3b   : > { %1448 = vmatprep.subr.bf16.mxu0 %v1548_v22  ;;  %1470 = vmatprep.subr.bf16.mxu1 %v1549_v23 }
  0x3e   : > { %1449 = vmatpush3.bf16.msra.mxu0 %v1550_v24  ;;  %1471 = vmatpush3.bf16.msra.mxu1 %v1551_v25 }
  0x3f   : > { %1450 = vmatprep.subr.bf16.mxu0 %v1552_v26  ;;  %1472 = vmatprep.subr.bf16.mxu1 %v1553_v27 }
  0x42   : > { %1451 = vmatpush3.bf16.msra.mxu0 %v1554_v28  ;;  %1473 = vmatpush3.bf16.msra.mxu1 %v1555_v29 }
  0x43   : > { %1452 = vmatprep.subr.bf16.mxu0 %v1556_v30  ;;  %1474 = vmatprep.subr.bf16.mxu1 %v1557_v31 }
  0x46   : > { %1453 = vmatpush3.bf16.msra.mxu0 %v1558_v32  ;;  %1475 = vmatpush3.bf16.msra.mxu1 %v1559_v33  ;;  %v1560_v33 = vld [vmem:[%s1893_s5] sm:$0xff]  }
  0xec   : > { %v616_v35 = vpop.f32.mrb[0].mxu0  ;;  %v659_v36 = vpop.f32.mrb[0].mxu1 }
  0xed   : > { %v618_v37 = vpop.f32.mrb[1].mxu0  ;;  %v661_v38 = vpop.f32.mrb[1].mxu1  ;;  %v617_v61 = vadd.f32 %v616_v35, %v376_v53  ;;  %v660_v63 = vadd.f32 %v659_v36, %v384_v54  ;;  %v1581_v35 = vmov 0.0  }
  0xee   : > { %v620_v39 = vpop.f32.mrb[2].mxu0  ;;  %v663_v40 = vpop.f32.mrb[2].mxu1  ;;  %v619_v0 = vadd.f32 %v618_v37, %v380_v55  ;;  %v662_v1 = vadd.f32 %v661_v38, %v388_v56  ;;  %1488 = vmatprep.subr.bf16.mxu0 %v1581_v35  ;;  %1496 = vmatprep.subr.bf16.mxu1 %v1581_v35  ;;  %v1395_v37 = vld [vmem:[%s1892_s4] ss:$0 sm:$0xff] }
  0xef   : > { %v622_v41 = vpop.f32.mrb[3].mxu0  ;;  %v665_v43 = vpop.f32.mrb[3].mxu1  ;;  %v621_v5 = vadd.f32 %v620_v39, %v376_v53  ;;  %v664_v6 = vadd.f32 %v663_v40, %v384_v54 }
  0xf0   : > { %v623_v11 = vadd.f32 %v622_v41, %v380_v55  ;;  %v666_v22 = vadd.f32 %v665_v43, %v388_v56 }
  0xfc   : > { %v702_v62 = vpop.f32.mrb[4].mxu0  ;;  %v745_v3 = vpop.f32.mrb[4].mxu1 }
  0xfd   : > { %v703_v2 = vadd.f32 %v702_v62, %v392_v57  ;;  %v704_v4 = vpop.f32.mrb[5].mxu0  ;;  %v746_v7 = vadd.f32 %v745_v3, %v400_v58  ;;  %v747_v9 = vpop.f32.mrb[5].mxu1  ;;  %v1428_v3 = vld [vmem:[%s1894_s6] ss:$0 sm:$0xff] }
  0xfe   : > { %v705_v8 = vadd.f32 %v704_v4, %v396_v59  ;;  %v706_v10 = vpop.f32.mrb[6].mxu0  ;;  %v748_v13 = vadd.f32 %v747_v9, %v404_v60  ;;  %v749_v15 = vpop.f32.mrb[6].mxu1 }
  0xff   : > { %v754_v12 = vmax.f32 %v617_v61, %v703_v2  ;;  %v707_v14 = vadd.f32 %v706_v10, %v392_v57  ;;  %v708_v16 = vpop.f32.mrb[7].mxu0  ;;  %v756_v17 = vmax.f32 %v660_v63, %v746_v7  ;;  %v750_v19 = vadd.f32 %v749_v15, %v400_v58  ;;  %v751_v21 = vpop.f32.mrb[7].mxu1  ;;  %v1563_v2 = vld [vmem:[%s1895_s7 + $0x8] sm:$0xff]  }
 0x100   : > { %v755_v18 = vmax.f32 %v619_v0, %v705_v8  ;;  %v709_v20 = vadd.f32 %v708_v16, %v396_v59  ;;  %v757_v23 = vmax.f32 %v662_v1, %v748_v13  ;;  %v752_v25 = vadd.f32 %v751_v21, %v404_v60  ;;  %v1562_v1 = vld [vmem:[%s1895_s7] sm:$0xff]  }
 0x101   : > { %v758_v24 = vmax.f32 %v621_v5, %v707_v14  ;;  %v760_v26 = vmax.f32 %v664_v6, %v750_v19  ;;  %v1432_v13 = vld [vmem:[%s1896_s8] ss:$0 sm:$0xff] }
 0x102   : > { %v759_v27 = vmax.f32 %v623_v11, %v709_v20  ;;  %v761_v29 = vmax.f32 %v666_v22, %v752_v25 }
 0x103   : > { %v762_v28 = vpack.c.bf16 %v758_v24, %v754_v12  ;;  %v764_v30 = vpack.c.bf16 %v760_v26, %v756_v17 }
 0x104   : > { %v763_v31 = vpack.c.bf16 %v759_v27, %v755_v18  ;;  %v765_v32 = vpack.c.bf16 %v761_v29, %v757_v23 }
 0x106   : > { %1061 = vmatprep.mubr.bf16.mxu0 %v763_v31  ;;  %1102 = vmatprep.mubr.bf16.mxu1 %v765_v32 }
 0x107   : > { %1062 = vmatmul.mubr.bf16.vlgmr.msra.gmra.mrb[8].mxu0 %v762_v28  ;;  %1103 = vmatmul.mubr.bf16.vlgmr.msra.gmra.mrb[8].mxu1 %v764_v30 }
 0x108   : > { %1489 = vmatpush3.bf16.msra.mxu0 %v1560_v33  ;;  %1492 = vmatprep.mubr.msk.bf16.mxu0 %vm1582_vm1, %v1581_v35 }
 0x109   : > { %1490 = vmatprep.subr.bf16.mxu0 %v1581_v35  ;;  %1500 = vmatprep.mubr.msk.bf16.mxu1 %vm1582_vm1, %v1581_v35 }
 0x10a   : > { %1497 = vmatpush3.bf16.msra.mxu1 %v1562_v1 }
 0x10b   : > { %1498 = vmatprep.subr.bf16.mxu1 %v1581_v35 }
 0x10c   : > { %1491 = vmatpush3.bf16.msra.mxu0 %v1561_v51 }
 0x10e   : > { %1499 = vmatpush3.bf16.msra.mxu1 %v1563_v2 }
 0x1da   : > { %v1454_v34 = vpop.f32.mrb[8].mxu0  ;;  %v1476_v36 = vpop.f32.mrb[8].mxu1 }
 0x1db   : > { %v1455_v38 = vpop.f32.mrb[9].mxu0  ;;  %v1477_v40 = vpop.f32.mrb[9].mxu1 }
 0x1dc   : > { %v1456_v39 = vadd.f32 %v1455_v38, %v1454_v34  ;;  %v1457_v41 = vpop.f32.mrb[10].mxu0  ;;  %v1478_v42 = vadd.f32 %v1477_v40, %v1476_v36  ;;  %v1479_v43 = vpop.f32.mrb[10].mxu1 }
 0x1dd   : > { %v1458_v44 = vpop.f32.mrb[11].mxu0  ;;  %v1480_v47 = vpop.f32.mrb[11].mxu1 }
 0x1de   : > { %v1064_v45 = vadd.f32 %v1456_v39, %v1395_v37  ;;  %v1459_v46 = vadd.f32 %v1458_v44, %v1457_v41  ;;  %v1481_v48 = vadd.f32 %v1480_v47, %v1479_v43 }
 0x1e0   : > { %v1105_v49 = vadd.f32 %v1478_v42, %v1064_v45  ;;  %v1067_v50 = vadd.f32 %v1459_v46, %v1395_v37 }
 0x1e2   : > { %v1108_v52 = vadd.f32 %v1481_v48, %v1067_v50 }
 0x1e4   : > { %v1517_v53 = vpack.i.bf16 %v1108_v52, %v1105_v49 }
 0x1e6   : > { %1518 = vrot.lane.b32.xlu0 %v1517_v53, %s1583_s19 }
 0x1ea   : > { %1523 = vrot.lane.b32.xlu0 %v1517_v53, %s1584_s20 }
 0x258   : > { %v1519_v54 = vpop.permute.xlu0 %1518 }
 0x259   : > { %v1521_v56 = vunpack.i.h.bf16 %v1519_v54  ;;  %v1520_v57 = vunpack.i.l.bf16 %v1519_v54 }
 0x25c   : > { %v1524_v55 = vpop.permute.xlu0 %1523 }
 0x25d   : > { %v1526_v58 = vunpack.i.h.bf16 %v1524_v55  ;;  %v1525_v59 = vunpack.i.l.bf16 %v1524_v55 }
 0x25f   : > { %v1126_v60 = vsel %vm1125_vm2, %v1520_v57, %v1525_v59  ;;  %v1127_v61 = vsel %vm1125_vm2, %v1521_v56, %v1526_v58 }
 0x260   : > { %v1128_v62 = vmax.f32 %v1105_v49, %v1126_v60  ;;  %v1129_v63 = vmax.f32 %v1108_v52, %v1127_v61 }
 0x262   : > { %v1130_v0 = vpack.c.bf16 %v1129_v63, %v1128_v62 }
 0x264   : > { %1493 = vmatmul.mubr.msk.bf16.vlgmr.msra.gmra.mrb[12].mxu0 %vm1154_vm3, %v1130_v0 }
 0x337   : > { %v1192_v4 = vpop.f32.mrb[12].mxu0 }
 0x338   : > { %v1193_v5 = vadd.f32 %v1428_v3, %v1192_v4  ;;  %v1494_v6 = vpop.f32.mrb[13].mxu0 }
 0x339   : > { %v1195_v7 = vpop.f32.mrb[14].mxu0 }
 0x33a   : > { %v1196_v8 = vadd.f32 %v1428_v3, %v1195_v7  ;;  %v1495_v9 = vpop.f32.mrb[15].mxu0  ;;  %v1199_v10 = vmax.f32 %v1193_v5, 0.0 }
 0x33c   : > { %v1200_v11 = vmax.f32 %v1196_v8, 0.0 }
 0x33e   : > { %v1201_v12 = vpack.c.bf16 %v1200_v11, %v1199_v10 }
 0x340   : > { %1501 = vmatmul.mubr.msk.bf16.vlgmr.msra.gmra.mrb[12].mxu1 %vm1154_vm3, %v1201_v12 }
 0x413   : > { %v1262_v14 = vpop.f32.mrb[12].mxu1 }
 0x414   : > { %v1263_v15 = vadd.f32 %v1432_v13, %v1262_v14  ;;  %v1502_v16 = vpop.f32.mrb[13].mxu1 }
 0x415   : > { %v1265_v17 = vpop.f32.mrb[14].mxu1 }
 0x416   : > { %v1266_v18 = vadd.f32 %v1432_v13, %v1265_v17  ;;  %v1503_v19 = vpop.f32.mrb[15].mxu1  ;;  %v1269_v20 = vsel %vm578_vm0, %v1263_v15, -inf }
 0x417   : > { %1270 = vmax.xlane.f32.xlu1 %v1269_v20 }
 0x418   : > { %v1272_v21 = vsel %vm578_vm0, %v1266_v18, -inf }
 0x41b   : > { %1273 = vmax.xlane.f32.xlu1 %v1272_v21 }
 0x4a4   : > { %v1271_v22 = vpop.xlane.xlu1 %1270 }
 0x4a5   : > { %v1275_v23 = vsub.f32 %v1263_v15, %v1271_v22 }
 0x4a7   : > { %v1277_v24 = vmul.f32 1.442695, %v1275_v23 }
 0x4a8   : > { %v1274_v25 = vpop.xlane.xlu1 %1273 }
 0x4a9   : > { %1564 = vpow2.f32 %v1277_v24  ;;  %v1276_v26 = vsub.f32 %v1266_v18, %v1274_v25 }
 0x4ab   : > { %v1279_v27 = vmul.f32 1.442695, %v1276_v26 }
 0x4ad   : > { %1566 = vpow2.f32 %v1279_v27 }
 0x4b3   : > { %v1565_v28 = vpop.eup %1564 }
 0x4b4   : > { %v1281_v29 = vsel %vm578_vm0, %v1565_v28, 0.0 }
 0x4b5   : > { %1282 = vadd.xlane.f32.xlu0 %v1281_v29 }
 0x4b7   : > { %v1567_v30 = vpop.eup %1566 }
 0x4b8   : > { %v1284_v31 = vsel %vm578_vm0, %v1567_v30, 0.0 }
 0x4b9   : > { %1285 = vadd.xlane.f32.xlu1 %v1284_v31 }
 0x542   : > { %v1283_v32 = vpop.xlane.xlu0 %1282 }
 0x543   : > { %1568 = vrcp.f32 %v1283_v32 }
 0x546   : > { %v1286_v33 = vpop.xlane.xlu1 %1285 }
 0x547   : > { %1570 = vrcp.f32 %v1286_v33 }
 0x54d   : > { %v1569_v34 = vpop.eup %1568 }
 0x54e   : > { %v1288_v35 = vmul.f32 %v1569_v34, %v1565_v28 }
 0x550   : > { %1291 = vst.msk [vmem:[%s334_s12] sm:$0xff] %vm578_vm0, %v1288_v35 }
 0x551   : > { %v1571_v36 = vpop.eup %1570 }
 0x552   : > { %v1290_v37 = vmul.f32 %v1571_v36, %v1567_v30 }
 0x554   : > { %1292 = vst.msk [vmem:[%s334_s12 + $0x8] sm:$0xff] %vm578_vm0, %v1290_v37 }
 0x555 PF: > { %s19_s30 = sadd.s32 1, %s1578_s30  }
 0x556   : > { %p16_p4 = scmp.ge.s32.totalorder %s19_s30, 4  }
 0x558   :  { %18 = sbr.rel (!%p16_p4) target bundleno = 1 (0x1), region = 86 }

</bundles_post_ra>
